<compile_context>
chip_gen: v5e
topology: v5e:2x2
jax: 0.10.0
libtpu: 0.0.40
codegen_flags: <defaults>
</compile_context>

<pallas_src>
import jax
import jax.numpy as jnp
from jax.experimental import pallas as pl
from jax.experimental.pallas import tpu as pltpu


_SQRT_2_OVER_PI = 0.7978845608028654
_GELU_C = 0.044715


def _gelu_tanh(x):
    # tanh-form GELU (runs on the EUP); max abs deviation from the exact-erf
    # GELU used by torch.nn.GELU() is ~1e-3, well inside the test tolerance.
    # TODO(synk): use lax.erf if a bit-tighter match to GELU(approximate='none') is needed.
    return 0.5 * x * (1.0 + jnp.tanh(_SQRT_2_OVER_PI * (x + _GELU_C * x * x * x)))


# ---------------------------------------------------------------------------
# Pallas kernel: one (TM, dim) row-tile per grid step
# ---------------------------------------------------------------------------
def _ffn_kernel(x_ref, w1_ref, b1_ref, w2_ref, b2_ref, o_ref):
    x = x_ref[...]                                            # (TM, dim) f32
    # Linear(dim -> hidden): bf16 MXU operands, f32 accumulation.
    h = jnp.dot(x.astype(jnp.bfloat16), w1_ref[...],
                preferred_element_type=jnp.float32)
    h = h + b1_ref[...]                                       # (TM, hidden) f32
    h = _gelu_tanh(h)                                         # f32 elementwise (EUP tanh)
    # Linear(hidden -> dim)
    y = jnp.dot(h.astype(jnp.bfloat16), w2_ref[...],
                preferred_element_type=jnp.float32)
    y = y + b2_ref[...]                                       # (TM, dim) f32
    o_ref[...] = y.astype(o_ref.dtype)


# ---------------------------------------------------------------------------
# Wrapper: flatten leading dims, tile rows, lay out weights for the MXU
# ---------------------------------------------------------------------------
def feed_forward(x, params, *, block_m=128):
    orig_shape = x.shape
    dim = orig_shape[-1]
    hidden = params["w1"].shape[0]
    assert params["w1"].shape == (hidden, dim)
    assert params["w2"].shape == (dim, hidden)

    x2 = x.reshape(-1, dim).astype(jnp.float32)
    m = x2.shape[0]

    # Row-tile size: whole array if small, else 128-row tiles (pad M up).
    if m <= block_m:
        tm, m_pad = m, m
    else:
        tm = block_m
        m_pad = ((m + tm - 1) // tm) * tm
    if m_pad != m:
        x2 = jnp.pad(x2, ((0, m_pad - m), (0, 0)))

    # Torch Linear weights (out, in) -> (in, out), cast once to bf16.
    w1t = jnp.swapaxes(params["w1"], 0, 1).astype(jnp.bfloat16)   # (dim, hidden)
    w2t = jnp.swapaxes(params["w2"], 0, 1).astype(jnp.bfloat16)   # (hidden, dim)
    b1 = params["b1"].reshape(1, hidden).astype(jnp.float32)
    b2 = params["b2"].reshape(1, dim).astype(jnp.float32)

    out = pl.pallas_call(
        _ffn_kernel,
        out_shape=jax.ShapeDtypeStruct((m_pad, dim), jnp.float32),
        grid=(m_pad // tm,),
        in_specs=[
            pl.BlockSpec((tm, dim), lambda i: (i, 0)),        # x row tile
            pl.BlockSpec((dim, hidden), lambda i: (0, 0)),    # W1^T (resident)
            pl.BlockSpec((1, hidden), lambda i: (0, 0)),      # b1
            pl.BlockSpec((hidden, dim), lambda i: (0, 0)),    # W2^T (resident)
            pl.BlockSpec((1, dim), lambda i: (0, 0)),         # b2
        ],
        out_specs=pl.BlockSpec((tm, dim), lambda i: (i, 0)),
        compiler_params=pltpu.CompilerParams(
            dimension_semantics=("parallel",)),
    )(x2, w1t, b1, w2t, b2)

    return out[:m].reshape(orig_shape)


# ---------------------------------------------------------------------------
# Deterministic parameter init (matches torch.nn.Linear default init)
# ---------------------------------------------------------------------------
def init_params(key, dim, hidden_dim):
    k1, k2, k3, k4 = jax.random.split(key, 4)
    bound1 = 1.0 / float(dim) ** 0.5
    bound2 = 1.0 / float(hidden_dim) ** 0.5
    w1 = jax.random.uniform(k1, (hidden_dim, dim), jnp.float32, -bound1, bound1)
    b1 = jax.random.uniform(k2, (hidden_dim,), jnp.float32, -bound1, bound1)
    w2 = jax.random.uniform(k3, (dim, hidden_dim), jnp.float32, -bound2, bound2)
    b2 = jax.random.uniform(k4, (dim,), jnp.float32, -bound2, bound2)
    return dict(w1=w1, b1=b1, w2=w2, b2=b2)


# ---------------------------------------------------------------------------
# Pure-JAX reference (f32, exact-erf GELU, matches torch semantics)
# ---------------------------------------------------------------------------
def feed_forward_reference(x, params):
    x = x.astype(jnp.float32)
    h = jnp.einsum('...i,oi->...o', x, params["w1"]) + params["b1"]
    h = 0.5 * h * (1.0 + jax.scipy.special.erf(h * 0.7071067811865476))
    return jnp.einsum('...i,oi->...o', h, params["w2"]) + params["b2"]


if __name__ == "__main__":
    key = jax.random.PRNGKey(0)
    kx, kp = jax.random.split(key)

    # Small, lane-dense shapes: batch=2, seq=128, dim=128, hidden=256.
    B, S, DIM, HIDDEN = 2, 128, 128, 256

    x = jax.random.normal(kx, (B, S, DIM), jnp.float32)
    params = init_params(kp, DIM, HIDDEN)

    out = feed_forward(x, params)
    out = jax.block_until_ready(out)

    ref = feed_forward_reference(x, params)
    assert out.shape == (B, S, DIM)
    assert bool(jnp.allclose(out, ref, atol=2e-2, rtol=2e-2))
    print("KERNEL_OK")
</pallas_src>

<mosaic_0001>
module attributes {stable_mosaic.version = 11 : i64} {
  func.func @_ffn_kernel(%arg0: i32, %arg1: memref<128x128xf32, #tpu.memory_space<vmem>>, %arg2: memref<128x256xbf16, #tpu.memory_space<vmem>>, %arg3: memref<1x256xf32, #tpu.memory_space<vmem>>, %arg4: memref<256x128xbf16, #tpu.memory_space<vmem>>, %arg5: memref<1x128xf32, #tpu.memory_space<vmem>>, %arg6: memref<128x128xf32, #tpu.memory_space<vmem>>) attributes {dimension_semantics = [#tpu.dimension_semantics<parallel>], iteration_bounds = array<i64: 2>, scalar_prefetch = 0 : i64, scratch_operands = 0 : i64, tpu.core_type = #tpu.core_type<tc>, window_params = [{transform_indices = @transform_0, window_bounds = array<i64: 128, 128>}, {pipeline_mode = #tpu.pipeline_mode<synchronous>, transform_indices = @transform_1, window_bounds = array<i64: 128, 256>}, {pipeline_mode = #tpu.pipeline_mode<synchronous>, transform_indices = @transform_2, window_bounds = array<i64: 1, 256>}, {pipeline_mode = #tpu.pipeline_mode<synchronous>, transform_indices = @transform_3, window_bounds = array<i64: 256, 128>}, {pipeline_mode = #tpu.pipeline_mode<synchronous>, transform_indices = @transform_4, window_bounds = array<i64: 1, 128>}, {transform_indices = @transform_5, window_bounds = array<i64: 128, 128>}]} {
    %c0 = arith.constant 0 : index
    %c0_0 = arith.constant 0 : index
    %0 = vector.load %arg1[%c0, %c0_0] : memref<128x128xf32, #tpu.memory_space<vmem>>, vector<128x128xf32>
    %1 = arith.truncf %0 : vector<128x128xf32> to vector<128x128xbf16>
    %c0_1 = arith.constant 0 : index
    %c0_2 = arith.constant 0 : index
    %2 = vector.load %arg2[%c0_1, %c0_2] : memref<128x256xbf16, #tpu.memory_space<vmem>>, vector<128x256xbf16>
    %cst = arith.constant dense<0.000000e+00> : vector<128x256xf32>
    %3 = tpu.matmul %1, %2, %cst {dimension_numbers = #tpu.dot_dimension_numbers<[1], [0], [0], [1], [0, 0, 1, 1], [], []>} : vector<128x128xbf16>, vector<128x256xbf16>, vector<128x256xf32> -> vector<128x256xf32>
    %c0_3 = arith.constant 0 : index
    %c0_4 = arith.constant 0 : index
    %4 = vector.load %arg3[%c0_3, %c0_4] : memref<1x256xf32, #tpu.memory_space<vmem>>, vector<1x256xf32>
    %5 = vector.broadcast %4 : vector<1x256xf32> to vector<128x256xf32>
    %6 = arith.addf %3, %5 : vector<128x256xf32>
    %cst_5 = arith.constant 5.000000e-01 : f32
    %7 = vector.broadcast %cst_5 : f32 to vector<128x256xf32>
    %8 = arith.mulf %7, %6 : vector<128x256xf32>
    %cst_6 = arith.constant 4.471500e-02 : f32
    %9 = vector.broadcast %cst_6 : f32 to vector<128x256xf32>
    %10 = arith.mulf %9, %6 : vector<128x256xf32>
    %11 = arith.mulf %10, %6 : vector<128x256xf32>
    %12 = arith.mulf %11, %6 : vector<128x256xf32>
    %13 = arith.addf %6, %12 : vector<128x256xf32>
    %cst_7 = arith.constant 0.797884583 : f32
    %14 = vector.broadcast %cst_7 : f32 to vector<128x256xf32>
    %15 = arith.mulf %14, %13 : vector<128x256xf32>
    %16 = math.tanh %15 : vector<128x256xf32>
    %cst_8 = arith.constant 1.000000e+00 : f32
    %17 = vector.broadcast %cst_8 : f32 to vector<128x256xf32>
    %18 = arith.addf %17, %16 : vector<128x256xf32>
    %19 = arith.mulf %8, %18 : vector<128x256xf32>
    %20 = arith.truncf %19 : vector<128x256xf32> to vector<128x256xbf16>
    %c0_9 = arith.constant 0 : index
    %c0_10 = arith.constant 0 : index
    %21 = vector.load %arg4[%c0_9, %c0_10] : memref<256x128xbf16, #tpu.memory_space<vmem>>, vector<256x128xbf16>
    %cst_11 = arith.constant dense<0.000000e+00> : vector<128x128xf32>
    %22 = tpu.matmul %20, %21, %cst_11 {dimension_numbers = #tpu.dot_dimension_numbers<[1], [0], [0], [1], [0, 0, 1, 1], [], []>} : vector<128x256xbf16>, vector<256x128xbf16>, vector<128x128xf32> -> vector<128x128xf32>
    %c0_12 = arith.constant 0 : index
    %c0_13 = arith.constant 0 : index
    %23 = vector.load %arg5[%c0_12, %c0_13] : memref<1x128xf32, #tpu.memory_space<vmem>>, vector<1x128xf32>
    %24 = vector.broadcast %23 : vector<1x128xf32> to vector<128x128xf32>
    %25 = arith.addf %22, %24 : vector<128x128xf32>
    %c0_14 = arith.constant 0 : index
    %c0_15 = arith.constant 0 : index
    %26 = vector.load %arg6[%c0_14, %c0_15] : memref<128x128xf32, #tpu.memory_space<vmem>>, vector<128x128xf32>
    tpu.vector_store %arg6[%c0_14, %c0_15], %25 {strides = array<i32>} : memref<128x128xf32, #tpu.memory_space<vmem>>, vector<128x128xf32>,
    return
  }
  func.func @transform_0(%arg0: i32) -> (i32, i32) {
    %c0_i32 = arith.constant 0 : i32
    %c0_i32_0 = arith.constant 0 : i32
    return %arg0, %c0_i32 : i32, i32
  }
  func.func @transform_1(%arg0: i32) -> (i32, i32) {
    %c0_i32 = arith.constant 0 : i32
    %c0_i32_0 = arith.constant 0 : i32
    %c0_i32_1 = arith.constant 0 : i32
    return %c0_i32, %c0_i32_0 : i32, i32
  }
  func.func @transform_2(%arg0: i32) -> (i32, i32) {
    %c0_i32 = arith.constant 0 : i32
    %c0_i32_0 = arith.constant 0 : i32
    %c0_i32_1 = arith.constant 0 : i32
    return %c0_i32, %c0_i32_0 : i32, i32
  }
  func.func @transform_3(%arg0: i32) -> (i32, i32) {
    %c0_i32 = arith.constant 0 : i32
    %c0_i32_0 = arith.constant 0 : i32
    %c0_i32_1 = arith.constant 0 : i32
    return %c0_i32, %c0_i32_0 : i32, i32
  }
  func.func @transform_4(%arg0: i32) -> (i32, i32) {
    %c0_i32 = arith.constant 0 : i32
    %c0_i32_0 = arith.constant 0 : i32
    %c0_i32_1 = arith.constant 0 : i32
    return %c0_i32, %c0_i32_0 : i32, i32
  }
  func.func @transform_5(%arg0: i32) -> (i32, i32) {
    %c0_i32 = arith.constant 0 : i32
    %c0_i32_0 = arith.constant 0 : i32
    return %arg0, %c0_i32 : i32, i32
  }
}

</mosaic_0001>

<bundles_post_ra>
// kernel: tpu_custom_call.1
= control target key start
LH: loop header
LB: loop body
LE: loop exit
PB: predicated region body
PF: predicated region fallthrough
CT: control target
= control target key end

     0   :  { %10 = vsyncpa [#allocation3], 0  ;;  %s2196_s0 = inlined_call_operand.hbm [shape: f32[256,128], index: 0, kind: input, shape index: {}]   ;;  %s2197_s1 = inlined_call_operand.hbm [shape: bf16[128,256], index: 1, kind: input, shape index: {}]   ;;  %s2198_s2 = inlined_call_operand.hbm [shape: f32[1,256], index: 2, kind: input, shape index: {}]   ;;  %s2199_s3 = inlined_call_operand.hbm [shape: bf16[256,128], index: 3, kind: input, shape index: {}]   ;;  %s2200_s4 = inlined_call_operand.vmem [shape: f32[1,128], index: 4, kind: input, shape index: {}]   ;;  %s2201_s5 = inlined_call_operand.hbm [shape: f32[256,128], index: 5, kind: output, shape index: {}]  }
   0x1   :  { %12 = vsyncpa [#allocation3 + $0x1], 0 }
   0x2   :  { %13 = vsyncpa [#allocation6], 0 }
   0x3   :  { %14 = vsyncpa [#allocation9], 0 }
   0x4   :  { %15 = vsyncpa [#allocation4], 0 }
   0x5   :  { %17 = vsyncpa [#allocation4 + $0x1], 0  ;;  %s1752_s18 = smov 0   ;;  %s1754_s19 = smov 0  }
   0x6   :  { %s1756_s20 = smov 0   ;;  %s1758_s21 = smov 0  }
   0x7 LB: > { %s1773_s22 = sadd.s32 4294967295, %s1711_s21   ;;  %s1187_s23 = sadd.s32 4294967294, %s1711_s21   ;;  %s1711_s21 = sphi %s1758_s21, %s2214_s21   ;;  %s1707_s20 = sphi %s1756_s20, %s2213_s20   ;;  %s1703_s19 = sphi %s1754_s19, %s2212_s19   ;;  %s1699_s18 = sphi %s1752_s18, %s2211_s18  }
   0x8   : > { %p43_p0 = scmp.ne.s32.totalorder %s1703_s19, %s1699_s18  ;;  %p44_p1 = scmp.eq.s32.totalorder %s1773_s22, 0 }
   0x9   : > { %p151_p2 = scmp.eq.s32.totalorder %s1773_s22, 1  ;;  %p157_p3 = scmp.eq.s32.totalorder %s1187_s23, 1 }
   0xa   : > { %p1782_p4 = por %p44_p1, %p43_p0  ;;  %p1188_p5 = scmp.ge.s32.totalorder %s1711_s21, 1 }
   0xb   : > { %p1787_p6 = por %p157_p3, %p43_p0  ;;  %p164_p7 = scmp.lt.s32.totalorder %s1711_s21, 3 }
   0xc   : > { %s175_s28 = sshll.u32 %s2197_s1, 4  ;;  %s1713_s30 = smov [#allocation5]   ;;  %s176_s28 = int_to_ptr.hbm [resolvable:$true] %s175_s28 }
   0xd   : > { %p1795_p8 = pnand %p1188_p5, %p164_p7  ;;  %s177_s6 = sshll.u32 %s1713_s30, 4  ;;  %s178_s6 = int_to_ptr.vmem [resolvable:$true] %s177_s6 }
   0xe   : > { %s190_s10 = sshll.u32 %s2198_s2, 4  ;;  %s2202_s11 = smov 128   ;;  %s191_s10 = int_to_ptr.hbm [resolvable:$true] %s190_s10 }
   0xf   : > { %p1385_p9 = pneg %p1795_p8  ;;  %s1715_s12 = smov 8  }
  0x10   : > { %s1716_s13 = smov [#allocation7]   ;;  %s201_s17 = sshll.u32 %s2199_s3, 4  ;;  %s202_s17 = int_to_ptr.hbm [resolvable:$true] %s201_s17 }
  0x11   : > { %p1803_p10 = pnand %p1385_p9, %p44_p1  ;;  %s192_s14 = sshll.u32 %s1716_s13, 4  ;;  %s193_s14 = int_to_ptr.vmem [resolvable:$true] %s192_s14 }
  0x12   : > { %s1717_s23 = smov [#allocation8]   ;;  %s1718_s27 = smov 64  }
  0x13   : > { %1388 = dma.hbm_to_vmem [thread:$0]  (!%p1803_p10), %s176_s28, 2048, %s178_s6, [#allocation6], %s2202_s11, %s2202_s11, %s1715_s12  }
  0x14   : > { %1391 = dma.hbm_to_vmem [thread:$0]  (!%p1803_p10), %s191_s10, 32, %s193_s14, [#allocation6]  }
  0x15   : > { %s203_s26 = sshll.u32 %s1717_s23, 4  ;;  %s1719_s28 = smov 4   ;;  %s204_s26 = int_to_ptr.vmem [resolvable:$true] %s203_s26 }
  0x16   : > { %1394 = dma.hbm_to_vmem [thread:$0]  (!%p1803_p10), %s202_s17, 2048, %s204_s26, [#allocation9], %s1718_s27, %s1718_s27, %s1719_s28  }
  0x17   : > { %s1824_s30 = sadd.s32 1, %s1711_s21   ;;  %s30_s8 = sadd.s32 1, %s1707_s20 }
  0x18   : > { %s27_s6 = ssub.s32 %s1711_s21, %s1824_s30  ;;  %p37_p13 = scmp.ne.s32.totalorder %s1707_s20, %s1703_s19 }
  0x19   : > { %p28_p12 = scmp.eq.s32.totalorder %s27_s6, 0  ;;  %p38_p0 = scmp.eq.s32.totalorder %s1711_s21, 0 }
  0x1a   : > { %p1837_p3 = por %p151_p2, %p37_p13  ;;  %p1406_p5 = scmp.lt.s32.totalorder %s1711_s21, 2 }
  0x1b   : > { %s1833_s9 = scalar_select %p28_p12, %s1707_s20, %s30_s8  }
  0x1c   : > { %s220_s13 = sand.u32 1, %s1707_s20   ;;  %s1335_s14 = sshll.u32 %s1711_s21, 7 }
  0x1d   : > { %p39_p7 = por %p38_p0, %p37_p13  ;;  %s1193_s7 = sshll.u32 %s220_s13, 7 }
  0x1e   : > { %s229_s17 = scalar_lea.hbm %s2196_s0, %s1335_s14  ;;  %s224_s26 = scalar_lea.vmem [#allocation2], %s1193_s7 }
  0x1f   : > { %s230_s23 = sshll.u32 %s229_s17, 4  ;;  %s232_s27 = sshll.u32 %s224_s26, 4  ;;  %s231_s23 = int_to_ptr.hbm [resolvable:$true] %s230_s23  ;;  %s233_s27 = int_to_ptr.vmem [resolvable:$true] %s232_s27 }
  0x20   : > { %p1847_p9 = pnand %p1406_p5, %p39_p7  ;;  %s221_s6 = scalar_lea.sflag [#allocation3], %s220_s13 }
  0x21   : > { %s1607_s8 = sshra.s32 %s231_s23, 4  ;;  %s1614_s7 = scalar_lea.hbm %s2196_s0, 256  ;;  %s1608_s8 = int_to_ptr.hbm [resolvable:$true] %s1607_s8 }
  0x22   : > { %s1609_s11 = scalar_lea.hbm %s1608_s8, 128  ;;  %p1611_p10 = pneg %p1847_p9 }
  0x23   : > { %p1610_p2 = scmp.ne.s32.totalorder %s1608_s8, %s1609_s11  ;;  %p1615_p0 = scmp.lt.s32.totalorder %s1608_s8, %s2196_s0 }
  0x24   : > { %p1616_p5 = scmp.lt.s32.totalorder %s1614_s7, %s1609_s11 }
  0x25   : > { %p1612_p12 = pnand %p1611_p10, %p1610_p2 }
  0x26   : > { %p1617_p7 = por %p1616_p5, %p1615_p0 }
  0x27   : > { %p1613_p13 = pneg %p1612_p12 }
  0x29   : > { %p1618_p11 = pnand %p1617_p7, %p1613_p13 }
  0x2b   : > { %1621 = shalt.err (!%p1618_p11)
}
  0x2c   : > { %s2209_s13 = smov 128   ;;  %244 = sbr.rel (%p1795_p8) target bundleno = 507 (0x1fb), region = 40 }
  0x2d   : > { %1398 = dma.hbm_to_vmem [thread:$0]  (!%p1847_p9), %s231_s23, 2048, %s233_s27, %s221_s6, %s2209_s13, %s2209_s13, %s1715_s12  }
  0x2e   : > { %s1867_s26 = sand.u32 (!%p1795_p8), 1, %s1703_s19  }
  0x2f   : > { %s1197_s11 = sshll.u32 (!%p1795_p8), %s1867_s26, 7  ;;  %s247_s8 = scalar_lea.sflag (!%p1795_p8), [#allocation3], %s1867_s26 }
  0x30   : > { %s1873_s14 = scalar_lea.vmem (!%p1795_p8), [#allocation2], %s1197_s11 }
  0x31   : > { %1682 = dma.done.wait (%p1782_p4), %s247_s8, 2048  }
  0x32   : > { %1684 = vsyncadd (%p1782_p4), %s247_s8, 4294965248 }
  0x33   : > { %1686 = dma.done.wait (%p44_p1), [#allocation6], 2080  }
  0x34   : > { %1688 = vsyncadd (%p44_p1), [#allocation6], 4294965216 }
  0x35   : > { %1690 = dma.done.wait (%p44_p1), [#allocation9], 2048  }
  0x36   : > { %1692 = vsyncadd (%p44_p1), [#allocation9], 4294965248  ;;  %v1260_v0 = vld [vmem:[#allocation5 + $0x70] sm:$0xf]  ;;  %v1351_v1 = vld [vmem:[#allocation5 + $0x74] sm:$0xf0] }
  0x37   : > { %v1350_v2 = vld [vmem:[#allocation5 + $0x74] sm:$0xf]  ;;  %v1261_v3 = vor.u32 %v1351_v1, %v1260_v0  ;;  %v1262_v4 = vld [vmem:[#allocation5 + $0x78] sm:$0xf0]  ;;  %v1252_v5 = vld [vmem:[#allocation5 + $0x60] sm:$0xf] }
  0x38   : > { %v1349_v6 = vld [vmem:[#allocation5 + $0x64] sm:$0xf0]  ;;  %v1265_v7 = vor.u32 %v1350_v2, %v1262_v4  ;;  %v1348_v8 = vld [vmem:[#allocation5 + $0x64] sm:$0xf]  ;;  %v1254_v9 = vld [vmem:[#allocation5 + $0x68] sm:$0xf0] }
  0x39   : > { %421 = vmatpush.bf16.msra.mxu0 %v1261_v3  ;;  %v1253_v10 = vor.u32 %v1349_v6, %v1252_v5  ;;  %v1257_v11 = vor.u32 %v1348_v8, %v1254_v9  ;;  %v1244_v12 = vld [vmem:[#allocation5 + $0x50] sm:$0xf]  ;;  %v1347_v13 = vld [vmem:[#allocation5 + $0x54] sm:$0xf0]  ;;  %v1346_v14 = vld [vmem:[#allocation5 + $0x54] sm:$0xf] }
  0x3a   : > { %470 = vmatpush.bf16.msra.mxu1 %v1265_v7  ;;  %v1246_v15 = vld [vmem:[#allocation5 + $0x58] sm:$0xf0]  ;;  %v1245_v16 = vor.u32 %v1347_v13, %v1244_v12  ;;  %v1236_v18 = vld [vmem:[#allocation5 + $0x40] sm:$0xf]  ;;  %v1345_v19 = vld [vmem:[#allocation5 + $0x44] sm:$0xf0] }
  0x3b   : > { %v1249_v17 = vor.u32 %v1346_v14, %v1246_v15  ;;  %v1344_v20 = vld [vmem:[#allocation5 + $0x44] sm:$0xf]  ;;  %v1238_v21 = vld [vmem:[#allocation5 + $0x48] sm:$0xf0]  ;;  %v1237_v22 = vor.u32 %v1345_v19, %v1236_v18  ;;  %v1228_v24 = vld [vmem:[#allocation5 + $0x30] sm:$0xf] }
  0x3c   : > { %v1241_v23 = vor.u32 %v1344_v20, %v1238_v21  ;;  %v1343_v25 = vld [vmem:[#allocation5 + $0x34] sm:$0xf0]  ;;  %v1342_v26 = vld [vmem:[#allocation5 + $0x34] sm:$0xf]  ;;  %v1230_v27 = vld [vmem:[#allocation5 + $0x38] sm:$0xf0] }
  0x3d   : > { %422 = vmatpush.bf16.msra.mxu0 %v1253_v10  ;;  %v1229_v28 = vor.u32 %v1343_v25, %v1228_v24  ;;  %v1233_v29 = vor.u32 %v1342_v26, %v1230_v27  ;;  %v1220_v30 = vld [vmem:[#allocation5 + $0x20] sm:$0xf]  ;;  %v1341_v31 = vld [vmem:[#allocation5 + $0x24] sm:$0xf0]  ;;  %v1340_v32 = vld [vmem:[#allocation5 + $0x24] sm:$0xf] }
  0x3e   : > { %471 = vmatpush.bf16.msra.mxu1 %v1257_v11  ;;  %v1222_v33 = vld [vmem:[#allocation5 + $0x28] sm:$0xf0]  ;;  %v1221_v34 = vor.u32 %v1341_v31, %v1220_v30  ;;  %v1212_v36 = vld [vmem:[#allocation5 + $0x10] sm:$0xf]  ;;  %v1339_v37 = vld [vmem:[#allocation5 + $0x14] sm:$0xf0] }
  0x3f   : > { %v1225_v35 = vor.u32 %v1340_v32, %v1222_v33  ;;  %v1338_v38 = vld [vmem:[#allocation5 + $0x14] sm:$0xf]  ;;  %v1214_v39 = vld [vmem:[#allocation5 + $0x18] sm:$0xf0]  ;;  %v1213_v40 = vor.u32 %v1339_v37, %v1212_v36  ;;  %v1204_v42 = vld [vmem:[#allocation5] sm:$0xf] }
  0x40   : > { %v1217_v41 = vor.u32 %v1338_v38, %v1214_v39  ;;  %v1337_v43 = vld [vmem:[#allocation5 + $0x4] sm:$0xf0]  ;;  %v1336_v44 = vld [vmem:[#allocation5 + $0x4] sm:$0xf]  ;;  %v1206_v45 = vld [vmem:[#allocation5 + $0x8] sm:$0xf0] }
  0x41   : > { %423 = vmatpush.bf16.msra.mxu0 %v1245_v16  ;;  %v1205_v46 = vor.u32 %v1337_v43, %v1204_v42  ;;  %v295_v47 = vld [vmem:[%s1873_s14] sm:$0xff]  ;;  %v296_v48 = vld [vmem:[%s1873_s14 + $0x8] sm:$0xff]  ;;  %v1209_v49 = vor.u32 %v1336_v44, %v1206_v45  ;;  %v297_v51 = vld [vmem:[%s1873_s14 + $0x10] sm:$0xff]  ;;  %s2129_s12 = scalar_lea.vmem [#allocation10], %s1197_s11  ;;  %s1368_s23 = sshll.u32 %s1773_s22, 7 }
  0x42   : > { %472 = vmatpush.bf16.msra.mxu1 %v1249_v17  ;;  %v311_v50 = vpack.c.bf16 %v296_v48, %v295_v47  ;;  %v298_v52 = vld [vmem:[%s1873_s14 + $0x18] sm:$0xff]  ;;  %v299_v54 = vld [vmem:[%s1873_s14 + $0x20] sm:$0xff]  ;;  %v300_v55 = vld [vmem:[%s1873_s14 + $0x28] sm:$0xff]  ;;  %s1081_s6 = scalar_lea.hbm %s2201_s5, %s1368_s23  ;;  %s1082_s15 = sshll.u32 %s2129_s12, 4  ;;  %s1083_s15 = int_to_ptr.vmem [resolvable:$true] %s1082_s15 }
  0x43   : > { %v312_v53 = vpack.c.bf16 %v298_v52, %v297_v51  ;;  %v313_v56 = vpack.c.bf16 %v300_v55, %v299_v54  ;;  %v301_v57 = vld [vmem:[%s1873_s14 + $0x30] sm:$0xff]  ;;  %v302_v58 = vld [vmem:[%s1873_s14 + $0x38] sm:$0xff]  ;;  %v303_v60 = vld [vmem:[%s1873_s14 + $0x40] sm:$0xff]  ;;  %s1084_s7 = sshll.u32 %s1081_s6, 4  ;;  %s1070_s16 = scalar_lea.sflag [#allocation4], %s1867_s26  ;;  %s1085_s7 = int_to_ptr.hbm [resolvable:$true] %s1084_s7 }
  0x44   : > { %v314_v59 = vpack.c.bf16 %v302_v58, %v301_v57  ;;  %v304_v61 = vld [vmem:[%s1873_s14 + $0x48] sm:$0xff]  ;;  %v305_v63 = vld [vmem:[%s1873_s14 + $0x50] sm:$0xff]  ;;  %v306_v0 = vld [vmem:[%s1873_s14 + $0x58] sm:$0xff]  ;;  %s1651_s17 = sshra.s32 %s1085_s7, 4  ;;  %s1657_s8 = scalar_lea.hbm %s2201_s5, 256  ;;  %s1652_s17 = int_to_ptr.hbm [resolvable:$true] %s1651_s17 }
  0x45   : > { %424 = vmatpush.bf16.msra.mxu0 %v1237_v22  ;;  %v315_v62 = vpack.c.bf16 %v304_v61, %v303_v60  ;;  %v316_v1 = vpack.c.bf16 %v306_v0, %v305_v63  ;;  %v307_v2 = vld [vmem:[%s1873_s14 + $0x60] sm:$0xff]  ;;  %v308_v3 = vld [vmem:[%s1873_s14 + $0x68] sm:$0xff]  ;;  %v1358_v7 = vld [vmem:[#allocation8 + $0x30] sm:$0xff]  ;;  %s1653_s22 = scalar_lea.hbm %s1652_s17, 128  ;;  %p1658_p11 = scmp.lt.s32.totalorder %s1652_s17, %s2201_s5 }
  0x46   : > { %473 = vmatpush.bf16.msra.mxu1 %v1241_v23  ;;  %v317_v4 = vpack.c.bf16 %v308_v3, %v307_v2  ;;  %v1359_v5 = vld [vmem:[#allocation8 + $0x38] sm:$0xff]  ;;  %v1366_v8 = vld [vmem:[#allocation8 + $0x70] sm:$0xff]  ;;  %v1357_v9 = vld [vmem:[#allocation8 + $0x28] sm:$0xff]  ;;  %p1654_p1 = scmp.ne.s32.totalorder %s1652_s17, %s1653_s22  ;;  %p1659_p9 = scmp.lt.s32.totalorder %s1657_s8, %s1653_s22 }
  0x47   : > { %v1367_v6 = vld [vmem:[#allocation8 + $0x78] sm:$0xff]  ;;  %955 = vmatpush.bf16.msra.mxu2 %v1359_v5  ;;  %v1365_v10 = vld [vmem:[#allocation8 + $0x68] sm:$0xff]  ;;  %v1356_v13 = vld [vmem:[#allocation8 + $0x20] sm:$0xff] }
  0x48   : > { %1004 = vmatpush.bf16.msra.mxu3 %v1367_v6  ;;  %v309_v11 = vld [vmem:[%s1873_s14 + $0x70] sm:$0xff]  ;;  %v310_v12 = vld [vmem:[%s1873_s14 + $0x78] sm:$0xff]  ;;  %v1364_v14 = vld [vmem:[#allocation8 + $0x60] sm:$0xff]  ;;  %p1655_p4 = pnand %p1654_p1, %p1837_p3  ;;  %p1660_p2 = por %p1659_p9, %p1658_p11 }
  0x49   : > { %425 = vmatpush.bf16.msra.mxu0 %v1229_v28  ;;  %v318_v15 = vpack.c.bf16 %v310_v12, %v309_v11  ;;  %v1355_v16 = vld [vmem:[#allocation8 + $0x18] sm:$0xff]  ;;  %v1354_v18 = vld [vmem:[#allocation8 + $0x10] sm:$0xff]  ;;  %v1353_v21 = vld [vmem:[#allocation8 + $0x8] sm:$0xff] }
  0x4a   : > { %474 = vmatpush.bf16.msra.mxu1 %v1233_v29  ;;  %v1363_v17 = vld [vmem:[#allocation8 + $0x58] sm:$0xff]  ;;  %v1362_v19 = vld [vmem:[#allocation8 + $0x50] sm:$0xff]  ;;  %v1361_v22 = vld [vmem:[#allocation8 + $0x48] sm:$0xff]  ;;  %p1656_p8 = pneg %p1655_p4 }
  0x4b   : > { %956 = vmatpush.bf16.msra.mxu2 %v1358_v7  ;;  %v335_v20 = vld [vmem:[#allocation7] sm:$0x3]  ;;  %v1352_v23 = vld [vmem:[#allocation8] sm:$0xff] }
  0x4c   : > { %1005 = vmatpush.bf16.msra.mxu3 %v1366_v8  ;;  %v1903_v24 = vperm.slane %v335_v20, 0  ;;  %v1360_v25 = vld [vmem:[#allocation8 + $0x40] sm:$0xff]  ;;  %v1905_v26 = vperm.slane %v335_v20, 1  ;;  %p1661_p10 = pnand %p1660_p2, %p1656_p8 }
  0x4d   : > { %426 = vmatpush.bf16.msra.mxu0 %v1221_v34 }
  0x4e   : > { %475 = vmatpush.bf16.msra.mxu1 %v1225_v35 }
  0x4f   : > { %957 = vmatpush.bf16.msra.mxu2 %v1357_v9 }
  0x50   : > { %1006 = vmatpush.bf16.msra.mxu3 %v1365_v10 }
  0x51   : > { %427 = vmatpush.bf16.msra.mxu0 %v1213_v40 }
  0x52   : > { %476 = vmatpush.bf16.msra.mxu1 %v1217_v41 }
  0x53   : > { %958 = vmatpush.bf16.msra.mxu2 %v1356_v13 }
  0x54   : > { %1007 = vmatpush.bf16.msra.mxu3 %v1364_v14 }
  0x55   : > { %428 = vmatpush.bf16.msra.mxu0 %v1205_v46 }
  0x56   : > { %477 = vmatpush.bf16.msra.mxu1 %v1209_v49 }
  0x57   : > { %959 = vmatpush.bf16.msra.mxu2 %v1355_v16 }
  0x58   : > { %429 = vmatmul.bf16.vlgmr.msra.gmra.mxu0 %v311_v50  ;;  %1008 = vmatpush.bf16.msra.mxu3 %v1363_v17 }
  0x59   : > { %478 = vmatmul.bf16.vlgmr.msra.gmra.mxu1 %v311_v50 }
  0x5b   : > { %960 = vmatpush.bf16.msra.mxu2 %v1354_v18 }
  0x5c   : > { %1009 = vmatpush.bf16.msra.mxu3 %v1362_v19 }
  0x5f   : > { %961 = vmatpush.bf16.msra.mxu2 %v1353_v21 }
  0x60   : > { %1010 = vmatpush.bf16.msra.mxu3 %v1361_v22 }
  0x63   : > { %962 = vmatpush.bf16.msra.mxu2 %v1352_v23 }
  0x64   : > { %1011 = vmatpush.bf16.msra.mxu3 %v1360_v25 }
  0x68   : > { %434 = vmatmul.bf16.gmra.mxu0 %v312_v53 }
  0x69   : > { %483 = vmatmul.bf16.gmra.mxu1 %v312_v53 }
  0x78   : > { %439 = vmatmul.bf16.gmra.mxu0 %v313_v56 }
  0x79   : > { %488 = vmatmul.bf16.gmra.mxu1 %v313_v56 }
  0x88   : > { %444 = vmatmul.bf16.gmra.mxu0 %v314_v59 }
  0x89   : > { %493 = vmatmul.bf16.gmra.mxu1 %v314_v59 }
  0x98   : > { %449 = vmatmul.bf16.gmra.mxu0 %v315_v62 }
  0x99   : > { %498 = vmatmul.bf16.gmra.mxu1 %v315_v62 }
  0xa8   : > { %454 = vmatmul.bf16.gmra.mxu0 %v316_v1 }
  0xa9   : > { %503 = vmatmul.bf16.gmra.mxu1 %v316_v1 }
  0xb8   : > { %459 = vmatmul.bf16.gmra.mxu0 %v317_v4 }
  0xb9   : > { %508 = vmatmul.bf16.gmra.mxu1 %v317_v4 }
  0xc8   : > { %464 = vmatmul.bf16.gmra.mxu0 %v318_v15 }
  0xc9   : > { %513 = vmatmul.bf16.gmra.mxu1 %v318_v15 }
  0xd5   : > { %v430_v27 = vpop.f32.mrf.mxu0 }
  0xd6   : > { %v431_v28 = vadd.f32 %v430_v27, %v1903_v24  ;;  %v479_v29 = vpop.f32.mrf.mxu1 }
  0xd7   : > { %v480_v30 = vadd.f32 %v479_v29, %v1905_v26 }
  0xd8   : > { %v551_v31 = vmul.f32 0.044715, %v431_v28  ;;  %v519_v12 = vmul.f32 0.5, %v431_v28 }
  0xd9   : > { %v552_v32 = vmul.f32 0.044715, %v480_v30  ;;  %v520_v18 = vmul.f32 0.5, %v480_v30 }
  0xda   : > { %v583_v33 = vmul.f32 %v551_v31, %v431_v28 }
  0xdb   : > { %v584_v34 = vmul.f32 %v552_v32, %v480_v30 }
  0xdc   : > { %v615_v35 = vmul.f32 %v583_v33, %v431_v28 }
  0xdd   : > { %v432_v36 = vpop.f32.mrf.mxu0  ;;  %v616_v37 = vmul.f32 %v584_v34, %v480_v30 }
  0xde   : > { %v433_v38 = vadd.f32 %v432_v36, %v1903_v24  ;;  %v481_v39 = vpop.f32.mrf.mxu1  ;;  %v647_v40 = vadd.f32 %v615_v35, %v431_v28 }
  0xdf   : > { %v482_v41 = vadd.f32 %v481_v39, %v1905_v26  ;;  %v648_v42 = vadd.f32 %v616_v37, %v480_v30 }
  0xe0   : > { %v553_v43 = vmul.f32 0.044715, %v433_v38  ;;  %v679_v46 = vmul.f32 0.7978846, %v647_v40  ;;  %v521_v16 = vmul.f32 0.5, %v433_v38 }
  0xe1   : > { %v554_v44 = vmul.f32 0.044715, %v482_v41  ;;  %v680_v48 = vmul.f32 0.7978846, %v648_v42  ;;  %v522_v19 = vmul.f32 0.5, %v482_v41 }
  0xe2   : > { %v585_v45 = vmul.f32 %v553_v43, %v433_v38  ;;  %1453 = vtanh.f32 %v679_v46 }
  0xe3   : > { %v586_v47 = vmul.f32 %v554_v44, %v482_v41  ;;  %1455 = vtanh.f32 %v680_v48 }
  0xe4   : > { %v617_v49 = vmul.f32 %v585_v45, %v433_v38 }
  0xe5   : > { %v435_v50 = vpop.f32.mrf.mxu0  ;;  %v618_v51 = vmul.f32 %v586_v47, %v482_v41 }
  0xe6   : > { %v1912_v52 = vadd.f32 %v435_v50, %v1903_v24  ;;  %v484_v53 = vpop.f32.mrf.mxu1  ;;  %v649_v54 = vadd.f32 %v617_v49, %v433_v38 }
  0xe7   : > { %v1915_v55 = vadd.f32 %v484_v53, %v1905_v26  ;;  %v650_v56 = vadd.f32 %v618_v51, %v482_v41 }
  0xe8   : > { %v555_v57 = vmul.f32 0.044715, %v1912_v52  ;;  %v681_v58 = vmul.f32 0.7978846, %v649_v54  ;;  %v1454_v63 = vpop.eup %1453 }
  0xe9   : > { %v556_v59 = vmul.f32 0.044715, %v1915_v55  ;;  %v682_v60 = vmul.f32 0.7978846, %v650_v56  ;;  %v1456_v1 = vpop.eup %1455  ;;  %v743_v8 = vadd.f32 1.0, %v1454_v63 }
  0xea   : > { %1457 = vtanh.f32 %v681_v58  ;;  %v587_v61 = vmul.f32 %v555_v57, %v1912_v52  ;;  %v744_v13 = vadd.f32 1.0, %v1456_v1 }
  0xeb   : > { %1459 = vtanh.f32 %v682_v60  ;;  %v588_v62 = vmul.f32 %v556_v59, %v1915_v55  ;;  %v775_v23 = vmul.f32 %v743_v8, %v519_v12 }
  0xec   : > { %v619_v0 = vmul.f32 %v587_v61, %v1912_v52  ;;  %v776_v31 = vmul.f32 %v744_v13, %v520_v18 }
  0xed   : > { %v437_v2 = vpop.f32.mrf.mxu0  ;;  %v620_v3 = vmul.f32 %v588_v62, %v1915_v55  ;;  %v523_v62 = vmul.f32 0.5, %v1912_v52 }
  0xee   : > { %v1924_v4 = vadd.f32 %v437_v2, %v1903_v24  ;;  %v486_v5 = vpop.f32.mrf.mxu1  ;;  %v651_v6 = vadd.f32 %v619_v0, %v1912_v52 }
  0xef   : > { %v1928_v7 = vadd.f32 %v486_v5, %v1905_v26  ;;  %v652_v9 = vadd.f32 %v620_v3, %v1915_v55  ;;  %v524_v5 = vmul.f32 0.5, %v1915_v55 }
  0xf0   : > { %v1458_v10 = vpop.eup %1457  ;;  %v557_v11 = vmul.f32 0.044715, %v1924_v4  ;;  %v683_v22 = vmul.f32 0.7978846, %v651_v6  ;;  %v525_v2 = vmul.f32 0.5, %v1924_v4 }
  0xf1   : > { %v1460_v14 = vpop.eup %1459  ;;  %v558_v15 = vmul.f32 0.044715, %v1928_v7  ;;  %v745_v17 = vadd.f32 1.0, %v1458_v10  ;;  %v684_v29 = vmul.f32 0.7978846, %v652_v9  ;;  %v526_v6 = vmul.f32 0.5, %v1928_v7 }
  0xf2   : > { %v746_v20 = vadd.f32 1.0, %v1460_v14  ;;  %v589_v21 = vmul.f32 %v557_v11, %v1924_v4  ;;  %1461 = vtanh.f32 %v683_v22 }
  0xf3   : > { %v777_v25 = vmul.f32 %v745_v17, %v521_v16  ;;  %v590_v27 = vmul.f32 %v558_v15, %v1928_v7  ;;  %1463 = vtanh.f32 %v684_v29 }
  0xf4   : > { %v778_v32 = vmul.f32 %v746_v20, %v522_v19  ;;  %v621_v28 = vmul.f32 %v589_v21, %v1924_v4 }
  0xf5   : > { %v440_v33 = vpop.f32.mrf.mxu0  ;;  %v807_v34 = vpack.c.bf16 %v777_v25, %v775_v23  ;;  %v622_v35 = vmul.f32 %v590_v27, %v1928_v7 }
  0xf6   : > { %v1938_v30 = vadd.f32 %v440_v33, %v1903_v24  ;;  %v489_v36 = vpop.f32.mrf.mxu1  ;;  %v808_v37 = vpack.c.bf16 %v778_v32, %v776_v31  ;;  %v653_v38 = vadd.f32 %v621_v28, %v1924_v4 }
  0xf7   : > { %v1942_v39 = vadd.f32 %v489_v36, %v1905_v26  ;;  %963 = vmatmul.bf16.vlgmr.msra.gmra.mxu2 %v807_v34  ;;  %v654_v40 = vadd.f32 %v622_v35, %v1928_v7 }
  0xf8   : > { %v559_v41 = vmul.f32 0.044715, %v1938_v30  ;;  %1012 = vmatmul.bf16.vlgmr.msra.gmra.mxu3 %v808_v37  ;;  %v685_v42 = vmul.f32 0.7978846, %v653_v38  ;;  %v1462_v47 = vpop.eup %1461 }
  0xf9   : > { %v560_v43 = vmul.f32 0.044715, %v1942_v39  ;;  %v686_v44 = vmul.f32 0.7978846, %v654_v40  ;;  %v1464_v49 = vpop.eup %1463  ;;  %v747_v58 = vadd.f32 1.0, %v1462_v47 }
  0xfa   : > { %1465 = vtanh.f32 %v685_v42  ;;  %v591_v45 = vmul.f32 %v559_v41, %v1938_v30  ;;  %v748_v63 = vadd.f32 1.0, %v1464_v49 }
  0xfb   : > { %1467 = vtanh.f32 %v686_v44  ;;  %v592_v46 = vmul.f32 %v560_v43, %v1942_v39  ;;  %v779_v11 = vmul.f32 %v747_v58, %v523_v62 }
  0xfc   : > { %v623_v48 = vmul.f32 %v591_v45, %v1938_v30  ;;  %v780_v14 = vmul.f32 %v748_v63, %v524_v5 }
  0xfd   : > { %v442_v50 = vpop.f32.mrf.mxu0  ;;  %v624_v51 = vmul.f32 %v592_v46, %v1942_v39  ;;  %v527_v46 = vmul.f32 0.5, %v1938_v30 }
  0xfe   : > { %v1952_v53 = vadd.f32 %v442_v50, %v1903_v24  ;;  %v491_v54 = vpop.f32.mrf.mxu1  ;;  %v655_v56 = vadd.f32 %v623_v48, %v1938_v30 }
  0xff   : > { %v1956_v57 = vadd.f32 %v491_v54, %v1905_v26  ;;  %v656_v59 = vadd.f32 %v624_v51, %v1942_v39  ;;  %v528_v54 = vmul.f32 0.5, %v1942_v39 }
 0x100   : > { %v1466_v60 = vpop.eup %1465  ;;  %v561_v61 = vmul.f32 0.044715, %v1952_v53  ;;  %v687_v10 = vmul.f32 0.7978846, %v655_v56  ;;  %v529_v50 = vmul.f32 0.5, %v1952_v53 }
 0x101   : > { %v1468_v0 = vpop.eup %1467  ;;  %v562_v1 = vmul.f32 0.044715, %v1956_v57  ;;  %v749_v3 = vadd.f32 1.0, %v1466_v60  ;;  %v688_v52 = vmul.f32 0.7978846, %v656_v59  ;;  %v530_v56 = vmul.f32 0.5, %v1956_v57 }
 0x102   : > { %v750_v8 = vadd.f32 1.0, %v1468_v0  ;;  %v593_v9 = vmul.f32 %v561_v61, %v1952_v53  ;;  %1469 = vtanh.f32 %v687_v10 }
 0x103   : > { %v781_v12 = vmul.f32 %v749_v3, %v525_v2  ;;  %v594_v13 = vmul.f32 %v562_v1, %v1956_v57  ;;  %1471 = vtanh.f32 %v688_v52 }
 0x104   : > { %v782_v15 = vmul.f32 %v750_v8, %v526_v6  ;;  %v625_v16 = vmul.f32 %v593_v9, %v1952_v53 }
 0x105   : > { %v445_v17 = vpop.f32.mrf.mxu0  ;;  %v809_v4 = vpack.c.bf16 %v781_v12, %v779_v11  ;;  %v626_v18 = vmul.f32 %v594_v13, %v1956_v57 }
 0x106   : > { %v1970_v55 = vadd.f32 %v445_v17, %v1903_v24  ;;  %v494_v7 = vpop.f32.mrf.mxu1  ;;  %v810_v19 = vpack.c.bf16 %v782_v15, %v780_v14  ;;  %v657_v20 = vadd.f32 %v625_v16, %v1952_v53 }
 0x107   : > { %v1974_v21 = vadd.f32 %v494_v7, %v1905_v26  ;;  %968 = vmatmul.bf16.gmra.mxu2 %v809_v4  ;;  %v658_v22 = vadd.f32 %v626_v18, %v1956_v57 }
 0x108   : > { %v563_v23 = vmul.f32 0.044715, %v1970_v55  ;;  %1017 = vmatmul.bf16.gmra.mxu3 %v810_v19  ;;  %v689_v25 = vmul.f32 0.7978846, %v657_v20  ;;  %v1470_v28 = vpop.eup %1469 }
 0x109   : > { %v564_v27 = vmul.f32 0.044715, %v1974_v21  ;;  %v690_v29 = vmul.f32 0.7978846, %v658_v22  ;;  %v1472_v34 = vpop.eup %1471  ;;  %v751_v42 = vadd.f32 1.0, %v1470_v28 }
 0x10a   : > { %1473 = vtanh.f32 %v689_v25  ;;  %v595_v31 = vmul.f32 %v563_v23, %v1970_v55  ;;  %v752_v47 = vadd.f32 1.0, %v1472_v34 }
 0x10b   : > { %1475 = vtanh.f32 %v690_v29  ;;  %v596_v32 = vmul.f32 %v564_v27, %v1974_v21  ;;  %v783_v61 = vmul.f32 %v751_v42, %v527_v46 }
 0x10c   : > { %v627_v33 = vmul.f32 %v595_v31, %v1970_v55  ;;  %v784_v0 = vmul.f32 %v752_v47, %v528_v54 }
 0x10d   : > { %v447_v35 = vpop.f32.mrf.mxu0  ;;  %v628_v36 = vmul.f32 %v596_v32, %v1974_v21  ;;  %v531_v32 = vmul.f32 0.5, %v1970_v55 }
 0x10e   : > { %v1984_v37 = vadd.f32 %v447_v35, %v1903_v24  ;;  %v496_v38 = vpop.f32.mrf.mxu1  ;;  %v659_v40 = vadd.f32 %v627_v33, %v1970_v55 }
 0x10f   : > { %v1988_v41 = vadd.f32 %v496_v38, %v1905_v26  ;;  %v660_v43 = vadd.f32 %v628_v36, %v1974_v21  ;;  %v532_v38 = vmul.f32 0.5, %v1974_v21 }
 0x110   : > { %v1474_v44 = vpop.eup %1473  ;;  %v565_v45 = vmul.f32 0.044715, %v1984_v37  ;;  %v691_v60 = vmul.f32 0.7978846, %v659_v40  ;;  %v533_v35 = vmul.f32 0.5, %v1984_v37 }
 0x111   : > { %v1476_v48 = vpop.eup %1475  ;;  %v566_v49 = vmul.f32 0.044715, %v1988_v41  ;;  %v753_v51 = vadd.f32 1.0, %v1474_v44  ;;  %v692_v30 = vmul.f32 0.7978846, %v660_v43  ;;  %v534_v40 = vmul.f32 0.5, %v1988_v41 }
 0x112   : > { %v754_v58 = vadd.f32 1.0, %v1476_v48  ;;  %v597_v59 = vmul.f32 %v565_v45, %v1984_v37  ;;  %1477 = vtanh.f32 %v691_v60 }
 0x113   : > { %v785_v62 = vmul.f32 %v753_v51, %v529_v50  ;;  %v598_v63 = vmul.f32 %v566_v49, %v1988_v41  ;;  %1479 = vtanh.f32 %v692_v30 }
 0x114   : > { %v786_v1 = vmul.f32 %v754_v58, %v530_v56  ;;  %v629_v2 = vmul.f32 %v597_v59, %v1984_v37 }
 0x115   : > { %v450_v3 = vpop.f32.mrf.mxu0  ;;  %v811_v53 = vpack.c.bf16 %v785_v62, %v783_v61  ;;  %v630_v5 = vmul.f32 %v598_v63, %v1988_v41 }
 0x116   : > { %v2002_v39 = vadd.f32 %v450_v3, %v1903_v24  ;;  %v499_v57 = vpop.f32.mrf.mxu1  ;;  %v812_v6 = vpack.c.bf16 %v786_v1, %v784_v0  ;;  %v661_v8 = vadd.f32 %v629_v2, %v1984_v37 }
 0x117   : > { %v2006_v9 = vadd.f32 %v499_v57, %v1905_v26  ;;  %973 = vmatmul.bf16.gmra.mxu2 %v811_v53  ;;  %v662_v10 = vadd.f32 %v630_v5, %v1988_v41 }
 0x118   : > { %v567_v11 = vmul.f32 0.044715, %v2002_v39  ;;  %1022 = vmatmul.bf16.gmra.mxu3 %v812_v6  ;;  %v693_v12 = vmul.f32 0.7978846, %v661_v8  ;;  %v1478_v16 = vpop.eup %1477 }
 0x119   : > { %v568_v13 = vmul.f32 0.044715, %v2006_v9  ;;  %v694_v52 = vmul.f32 0.7978846, %v662_v10  ;;  %v1480_v4 = vpop.eup %1479  ;;  %v755_v25 = vadd.f32 1.0, %v1478_v16 }
 0x11a   : > { %1481 = vtanh.f32 %v693_v12  ;;  %v599_v14 = vmul.f32 %v567_v11, %v2002_v39  ;;  %v756_v28 = vadd.f32 1.0, %v1480_v4 }
 0x11b   : > { %1483 = vtanh.f32 %v694_v52  ;;  %v600_v15 = vmul.f32 %v568_v13, %v2006_v9  ;;  %v787_v45 = vmul.f32 %v755_v25, %v531_v32 }
 0x11c   : > { %v631_v17 = vmul.f32 %v599_v14, %v2002_v39  ;;  %v788_v48 = vmul.f32 %v756_v28, %v532_v38 }
 0x11d   : > { %v452_v18 = vpop.f32.mrf.mxu0  ;;  %v632_v7 = vmul.f32 %v600_v15, %v2006_v9  ;;  %v535_v15 = vmul.f32 0.5, %v2002_v39 }
 0x11e   : > { %v2016_v19 = vadd.f32 %v452_v18, %v1903_v24  ;;  %v501_v20 = vpop.f32.mrf.mxu1  ;;  %v663_v22 = vadd.f32 %v631_v17, %v2002_v39 }
 0x11f   : > { %v2020_v23 = vadd.f32 %v501_v20, %v1905_v26  ;;  %v664_v27 = vadd.f32 %v632_v7, %v2006_v9  ;;  %v536_v20 = vmul.f32 0.5, %v2006_v9 }
 0x120   : > { %v1482_v29 = vpop.eup %1481  ;;  %v569_v31 = vmul.f32 0.044715, %v2016_v19  ;;  %v695_v44 = vmul.f32 0.7978846, %v663_v22  ;;  %v537_v18 = vmul.f32 0.5, %v2016_v19 }
 0x121   : > { %v1484_v33 = vpop.eup %1483  ;;  %v570_v34 = vmul.f32 0.044715, %v2020_v23  ;;  %v757_v36 = vadd.f32 1.0, %v1482_v29  ;;  %v696_v55 = vmul.f32 0.7978846, %v664_v27  ;;  %v538_v22 = vmul.f32 0.5, %v2020_v23 }
 0x122   : > { %v758_v42 = vadd.f32 1.0, %v1484_v33  ;;  %v601_v43 = vmul.f32 %v569_v31, %v2016_v19  ;;  %1485 = vtanh.f32 %v695_v44 }
 0x123   : > { %v789_v46 = vmul.f32 %v757_v36, %v533_v35  ;;  %v602_v47 = vmul.f32 %v570_v34, %v2020_v23  ;;  %1487 = vtanh.f32 %v696_v55 }
 0x124   : > { %v790_v49 = vmul.f32 %v758_v42, %v534_v40  ;;  %v633_v50 = vmul.f32 %v601_v43, %v2016_v19 }
 0x125   : > { %v455_v51 = vpop.f32.mrf.mxu0  ;;  %v813_v37 = vpack.c.bf16 %v789_v46, %v787_v45  ;;  %v634_v54 = vmul.f32 %v602_v47, %v2020_v23 }
 0x126   : > { %v2034_v21 = vadd.f32 %v455_v51, %v1903_v24  ;;  %v504_v41 = vpop.f32.mrf.mxu1  ;;  %v814_v56 = vpack.c.bf16 %v790_v49, %v788_v48  ;;  %v665_v58 = vadd.f32 %v633_v50, %v2016_v19 }
 0x127   : > { %v2038_v59 = vadd.f32 %v504_v41, %v1905_v26  ;;  %978 = vmatmul.bf16.gmra.mxu2 %v813_v37  ;;  %v666_v60 = vadd.f32 %v634_v54, %v2020_v23 }
 0x128   : > { %v571_v61 = vmul.f32 0.044715, %v2034_v21  ;;  %1027 = vmatmul.bf16.gmra.mxu3 %v814_v56  ;;  %v697_v62 = vmul.f32 0.7978846, %v665_v58  ;;  %v1486_v2 = vpop.eup %1485 }
 0x129   : > { %v572_v63 = vmul.f32 0.044715, %v2038_v59  ;;  %v698_v30 = vmul.f32 0.7978846, %v666_v60  ;;  %v1488_v53 = vpop.eup %1487  ;;  %v759_v12 = vadd.f32 1.0, %v1486_v2 }
 0x12a   : > { %1489 = vtanh.f32 %v697_v62  ;;  %v603_v0 = vmul.f32 %v571_v61, %v2034_v21  ;;  %v760_v16 = vadd.f32 1.0, %v1488_v53 }
 0x12b   : > { %1491 = vtanh.f32 %v698_v30  ;;  %v604_v1 = vmul.f32 %v572_v63, %v2038_v59  ;;  %v791_v31 = vmul.f32 %v759_v12, %v535_v15 }
 0x12c   : > { %v635_v3 = vmul.f32 %v603_v0, %v2034_v21  ;;  %v792_v33 = vmul.f32 %v760_v16, %v536_v20 }
 0x12d   : > { %v457_v5 = vpop.f32.mrf.mxu0  ;;  %v636_v57 = vmul.f32 %v604_v1, %v2038_v59  ;;  %v539_v1 = vmul.f32 0.5, %v2034_v21 }
 0x12e   : > { %v2048_v6 = vadd.f32 %v457_v5, %v1903_v24  ;;  %v506_v8 = vpop.f32.mrf.mxu1  ;;  %v667_v10 = vadd.f32 %v635_v3, %v2034_v21 }
 0x12f   : > { %v2052_v11 = vadd.f32 %v506_v8, %v1905_v26  ;;  %v668_v13 = vadd.f32 %v636_v57, %v2038_v59  ;;  %v540_v8 = vmul.f32 0.5, %v2038_v59 }
 0x130   : > { %v1490_v52 = vpop.eup %1489  ;;  %v573_v14 = vmul.f32 0.044715, %v2048_v6  ;;  %v699_v29 = vmul.f32 0.7978846, %v667_v10  ;;  %v541_v5 = vmul.f32 0.5, %v2048_v6 }
 0x131   : > { %v1492_v17 = vpop.eup %1491  ;;  %v574_v4 = vmul.f32 0.044715, %v2052_v11  ;;  %v761_v7 = vadd.f32 1.0, %v1490_v52  ;;  %v700_v39 = vmul.f32 0.7978846, %v668_v13  ;;  %v542_v10 = vmul.f32 0.5, %v2052_v11 }
 0x132   : > { %v762_v25 = vadd.f32 1.0, %v1492_v17  ;;  %v605_v27 = vmul.f32 %v573_v14, %v2048_v6  ;;  %1493 = vtanh.f32 %v699_v29 }
 0x133   : > { %v793_v32 = vmul.f32 %v761_v7, %v537_v18  ;;  %v606_v28 = vmul.f32 %v574_v4, %v2052_v11  ;;  %1495 = vtanh.f32 %v700_v39 }
 0x134   : > { %v794_v34 = vmul.f32 %v762_v25, %v538_v22  ;;  %v637_v35 = vmul.f32 %v605_v27, %v2048_v6 }
 0x135   : > { %v460_v36 = vpop.f32.mrf.mxu0  ;;  %v815_v19 = vpack.c.bf16 %v793_v32, %v791_v31  ;;  %v638_v38 = vmul.f32 %v606_v28, %v2052_v11 }
 0x136   : > { %v2066_v9 = vadd.f32 %v460_v36, %v1903_v24  ;;  %v509_v23 = vpop.f32.mrf.mxu1  ;;  %v816_v40 = vpack.c.bf16 %v794_v34, %v792_v33  ;;  %v669_v42 = vadd.f32 %v637_v35, %v2048_v6 }
 0x137   : > { %v2070_v43 = vadd.f32 %v509_v23, %v1905_v26  ;;  %983 = vmatmul.bf16.gmra.mxu2 %v815_v19  ;;  %v670_v44 = vadd.f32 %v638_v38, %v2052_v11 }
 0x138   : > { %v575_v45 = vmul.f32 0.044715, %v2066_v9  ;;  %1032 = vmatmul.bf16.gmra.mxu3 %v816_v40  ;;  %v701_v46 = vmul.f32 0.7978846, %v669_v42  ;;  %v1494_v50 = vpop.eup %1493 }
 0x139   : > { %v576_v47 = vmul.f32 0.044715, %v2070_v43  ;;  %v702_v55 = vmul.f32 0.7978846, %v670_v44  ;;  %v1496_v37 = vpop.eup %1495  ;;  %v763_v62 = vadd.f32 1.0, %v1494_v50 }
 0x13a   : > { %1497 = vtanh.f32 %v701_v46  ;;  %v607_v48 = vmul.f32 %v575_v45, %v2066_v9  ;;  %v764_v2 = vadd.f32 1.0, %v1496_v37 }
 0x13b   : > { %1499 = vtanh.f32 %v702_v55  ;;  %v608_v49 = vmul.f32 %v576_v47, %v2070_v43  ;;  %v795_v14 = vmul.f32 %v763_v62, %v539_v1 }
 0x13c   : > { %v639_v51 = vmul.f32 %v607_v48, %v2066_v9  ;;  %v796_v17 = vmul.f32 %v764_v2, %v540_v8 }
 0x13d   : > { %v462_v54 = vpop.f32.mrf.mxu0  ;;  %v640_v41 = vmul.f32 %v608_v49, %v2070_v43  ;;  %v543_v49 = vmul.f32 0.5, %v2066_v9 }
 0x13e   : > { %v2080_v56 = vadd.f32 %v462_v54, %v1903_v24  ;;  %v511_v58 = vpop.f32.mrf.mxu1  ;;  %v671_v60 = vadd.f32 %v639_v51, %v2066_v9 }
 0x13f   : > { %v2084_v61 = vadd.f32 %v511_v58, %v1905_v26  ;;  %v672_v63 = vadd.f32 %v640_v41, %v2070_v43 }
 0x140   : > { %v1498_v30 = vpop.eup %1497  ;;  %v577_v0 = vmul.f32 0.044715, %v2080_v56  ;;  %v703_v52 = vmul.f32 0.7978846, %v671_v60  ;;  %v545_v54 = vmul.f32 0.5, %v2080_v56 }
 0x141   : > { %v1500_v3 = vpop.eup %1499  ;;  %v578_v53 = vmul.f32 0.044715, %v2084_v61  ;;  %v765_v57 = vadd.f32 1.0, %v1498_v30  ;;  %v704_v21 = vmul.f32 0.7978846, %v672_v63  ;;  %v546_v58 = vmul.f32 0.5, %v2084_v61 }
 0x142   : > { %v766_v12 = vadd.f32 1.0, %v1500_v3  ;;  %v609_v13 = vmul.f32 %v577_v0, %v2080_v56  ;;  %1501 = vtanh.f32 %v703_v52 }
 0x143   : > { %v797_v15 = vmul.f32 %v765_v57, %v541_v5  ;;  %v610_v16 = vmul.f32 %v578_v53, %v2084_v61  ;;  %1503 = vtanh.f32 %v704_v21 }
 0x144   : > { %v798_v4 = vmul.f32 %v766_v12, %v542_v10  ;;  %v641_v18 = vmul.f32 %v609_v13, %v2080_v56 }
 0x145   : > { %v465_v7 = vpop.f32.mrf.mxu0  ;;  %v817_v6 = vpack.c.bf16 %v797_v15, %v795_v14  ;;  %v642_v20 = vmul.f32 %v610_v16, %v2084_v61 }
 0x146   : > { %v2098_v59 = vadd.f32 %v465_v7, %v1903_v24  ;;  %v514_v11 = vpop.f32.mrf.mxu1  ;;  %v818_v22 = vpack.c.bf16 %v798_v4, %v796_v17  ;;  %v673_v25 = vadd.f32 %v641_v18, %v2080_v56 }
 0x147   : > { %v2102_v27 = vadd.f32 %v514_v11, %v1905_v26  ;;  %988 = vmatmul.bf16.gmra.mxu2 %v817_v6  ;;  %v674_v29 = vadd.f32 %v642_v20, %v2084_v61 }
 0x148   : > { %v579_v31 = vmul.f32 0.044715, %v2098_v59  ;;  %1037 = vmatmul.bf16.gmra.mxu3 %v818_v22  ;;  %v705_v32 = vmul.f32 0.7978846, %v673_v25  ;;  %v1502_v35 = vpop.eup %1501  ;;  %v547_v16 = vmul.f32 0.5, %v2098_v59 }
 0x149   : > { %v580_v28 = vmul.f32 0.044715, %v2102_v27  ;;  %v706_v39 = vmul.f32 0.7978846, %v674_v29  ;;  %v1504_v19 = vpop.eup %1503  ;;  %v767_v46 = vadd.f32 1.0, %v1502_v35  ;;  %v548_v4 = vmul.f32 0.5, %v2102_v27 }
 0x14a   : > { %1505 = vtanh.f32 %v705_v32  ;;  %v611_v33 = vmul.f32 %v579_v31, %v2098_v59  ;;  %v768_v50 = vadd.f32 1.0, %v1504_v19  ;;  %v2124_v31 = vld [vmem:[%s2200_s4] ss:$0 sm:$0xff] }
 0x14b   : > { %1507 = vtanh.f32 %v706_v39  ;;  %v612_v34 = vmul.f32 %v580_v28, %v2102_v27  ;;  %v799_v63 = vmul.f32 %v767_v46, %v543_v49 }
 0x14c   : > { %v643_v36 = vmul.f32 %v611_v33, %v2098_v59 }
 0x14d   : > { %v467_v38 = vpop.f32.mrf.mxu0  ;;  %v644_v23 = vmul.f32 %v612_v34, %v2102_v27 }
 0x14e   : > { %v468_v40 = vadd.f32 %v467_v38, %v1903_v24  ;;  %v516_v42 = vpop.f32.mrf.mxu1  ;;  %v675_v44 = vadd.f32 %v643_v36, %v2098_v59  ;;  %v544_v24 = vmul.f32 0.5, %v2070_v43 }
 0x14f   : > { %v517_v45 = vadd.f32 %v516_v42, %v1905_v26  ;;  %v676_v47 = vadd.f32 %v644_v23, %v2102_v27 }
 0x150   : > { %v1506_v55 = vpop.eup %1505  ;;  %v581_v48 = vmul.f32 0.044715, %v468_v40  ;;  %v707_v26 = vmul.f32 0.7978846, %v675_v44  ;;  %v800_v2 = vmul.f32 %v768_v50, %v544_v24  ;;  %v549_v21 = vmul.f32 0.5, %v468_v40 }
 0x151   : > { %v1508_v51 = vpop.eup %1507  ;;  %v582_v37 = vmul.f32 0.044715, %v517_v45  ;;  %v769_v41 = vadd.f32 1.0, %v1506_v55  ;;  %v708_v1 = vmul.f32 0.7978846, %v676_v47  ;;  %v550_v18 = vmul.f32 0.5, %v517_v45 }
 0x152   : > { %v770_v60 = vadd.f32 1.0, %v1508_v51  ;;  %v613_v62 = vmul.f32 %v581_v48, %v468_v40  ;;  %1509 = vtanh.f32 %v707_v26 }
 0x153   : > { %v801_v30 = vmul.f32 %v769_v41, %v545_v54  ;;  %v614_v0 = vmul.f32 %v582_v37, %v517_v45  ;;  %1511 = vtanh.f32 %v708_v1 }
 0x154   : > { %v802_v3 = vmul.f32 %v770_v60, %v546_v58  ;;  %v645_v9 = vmul.f32 %v613_v62, %v468_v40 }
 0x155   : > { %v819_v53 = vpack.c.bf16 %v801_v30, %v799_v63  ;;  %v646_v5 = vmul.f32 %v614_v0, %v517_v45 }
 0x156   : > { %v820_v57 = vpack.c.bf16 %v802_v3, %v800_v2  ;;  %v677_v8 = vadd.f32 %v645_v9, %v468_v40 }
 0x157   : > { %993 = vmatmul.bf16.gmra.mxu2 %v819_v53  ;;  %v678_v56 = vadd.f32 %v646_v5, %v517_v45 }
 0x158   : > { %1042 = vmatmul.bf16.gmra.mxu3 %v820_v57  ;;  %v709_v43 = vmul.f32 0.7978846, %v677_v8  ;;  %v1510_v10 = vpop.eup %1509 }
 0x159   : > { %v710_v61 = vmul.f32 0.7978846, %v678_v56  ;;  %v1512_v12 = vpop.eup %1511  ;;  %v771_v13 = vadd.f32 1.0, %v1510_v10 }
 0x15a   : > { %1513 = vtanh.f32 %v709_v43  ;;  %v772_v14 = vadd.f32 1.0, %v1512_v12 }
 0x15b   : > { %1515 = vtanh.f32 %v710_v61  ;;  %v803_v6 = vmul.f32 %v771_v13, %v547_v16 }
 0x15c   : > { %v804_v11 = vmul.f32 %v772_v14, %v548_v4 }
 0x160   : > { %v1514_v52 = vpop.eup %1513 }
 0x161   : > { %v1516_v15 = vpop.eup %1515  ;;  %v773_v17 = vadd.f32 1.0, %v1514_v52 }
 0x162   : > { %v774_v7 = vadd.f32 1.0, %v1516_v15 }
 0x163   : > { %v805_v20 = vmul.f32 %v773_v17, %v549_v21 }
 0x164   : > { %v806_v22 = vmul.f32 %v774_v7, %v550_v18 }
 0x165   : > { %v821_v25 = vpack.c.bf16 %v805_v20, %v803_v6 }
 0x166   : > { %v822_v29 = vpack.c.bf16 %v806_v22, %v804_v11 }
 0x167   : > { %998 = vmatmul.bf16.gmra.mxu2 %v821_v25 }
 0x168   : > { %1047 = vmatmul.bf16.gmra.mxu3 %v822_v29 }
 0x17a   : > { %v964_v59 = vpop.f32.mrf.mxu2 }
 0x17b   : > { %v965_v32 = vadd.f32 %v2124_v31, %v964_v59  ;;  %v1013_v27 = vpop.f32.mrf.mxu3 }
 0x17d   : > { %v1014_v28 = vadd.f32 %v1013_v27, %v965_v32 }
 0x17f   : > { %1053 = vst [vmem:[%s2129_s12] sm:$0xff] %v1014_v28 }
 0x182   : > { %v966_v39 = vpop.f32.mrf.mxu2 }
 0x183   : > { %v967_v33 = vadd.f32 %v2124_v31, %v966_v39  ;;  %v1015_v34 = vpop.f32.mrf.mxu3 }
 0x185   : > { %v1016_v35 = vadd.f32 %v1015_v34, %v967_v33 }
 0x187   : > { %1054 = vst [vmem:[%s2129_s12 + $0x8] sm:$0xff] %v1016_v35 }
 0x18a   : > { %v969_v36 = vpop.f32.mrf.mxu2 }
 0x18b   : > { %v970_v19 = vadd.f32 %v2124_v31, %v969_v36  ;;  %v1018_v38 = vpop.f32.mrf.mxu3 }
 0x18d   : > { %v1019_v23 = vadd.f32 %v1018_v38, %v970_v19 }
 0x18f   : > { %1055 = vst [vmem:[%s2129_s12 + $0x10] sm:$0xff] %v1019_v23 }
 0x192   : > { %v971_v40 = vpop.f32.mrf.mxu2 }
 0x193   : > { %v972_v42 = vadd.f32 %v2124_v31, %v971_v40  ;;  %v1020_v44 = vpop.f32.mrf.mxu3 }
 0x195   : > { %v1021_v45 = vadd.f32 %v1020_v44, %v972_v42 }
 0x197   : > { %1056 = vst [vmem:[%s2129_s12 + $0x18] sm:$0xff] %v1021_v45 }
 0x19a   : > { %v974_v46 = vpop.f32.mrf.mxu2 }
 0x19b   : > { %v975_v47 = vadd.f32 %v2124_v31, %v974_v46  ;;  %v1023_v55 = vpop.f32.mrf.mxu3 }
 0x19d   : > { %v1024_v48 = vadd.f32 %v1023_v55, %v975_v47 }
 0x19f   : > { %1057 = vst [vmem:[%s2129_s12 + $0x20] sm:$0xff] %v1024_v48 }
 0x1a2   : > { %v976_v49 = vpop.f32.mrf.mxu2 }
 0x1a3   : > { %v977_v50 = vadd.f32 %v2124_v31, %v976_v49  ;;  %v1025_v51 = vpop.f32.mrf.mxu3 }
 0x1a5   : > { %v1026_v37 = vadd.f32 %v1025_v51, %v977_v50 }
 0x1a7   : > { %1058 = vst [vmem:[%s2129_s12 + $0x28] sm:$0xff] %v1026_v37 }
 0x1aa   : > { %v979_v54 = vpop.f32.mrf.mxu2 }
 0x1ab   : > { %v980_v41 = vadd.f32 %v2124_v31, %v979_v54  ;;  %v1028_v24 = vpop.f32.mrf.mxu3 }
 0x1ad   : > { %v1029_v58 = vadd.f32 %v1028_v24, %v980_v41 }
 0x1af   : > { %1059 = vst [vmem:[%s2129_s12 + $0x30] sm:$0xff] %v1029_v58 }
 0x1b2   : > { %v981_v60 = vpop.f32.mrf.mxu2 }
 0x1b3   : > { %v982_v62 = vadd.f32 %v2124_v31, %v981_v60  ;;  %v1030_v26 = vpop.f32.mrf.mxu3 }
 0x1b5   : > { %v1031_v63 = vadd.f32 %v1030_v26, %v982_v62 }
 0x1b7   : > { %1060 = vst [vmem:[%s2129_s12 + $0x38] sm:$0xff] %v1031_v63 }
 0x1ba   : > { %v984_v30 = vpop.f32.mrf.mxu2 }
 0x1bb   : > { %v985_v0 = vadd.f32 %v2124_v31, %v984_v30  ;;  %v1033_v1 = vpop.f32.mrf.mxu3 }
 0x1bd   : > { %v1034_v2 = vadd.f32 %v1033_v1, %v985_v0 }
 0x1bf   : > { %1061 = vst [vmem:[%s2129_s12 + $0x40] sm:$0xff] %v1034_v2 }
 0x1c2   : > { %v986_v3 = vpop.f32.mrf.mxu2 }
 0x1c3   : > { %v987_v9 = vadd.f32 %v2124_v31, %v986_v3  ;;  %v1035_v53 = vpop.f32.mrf.mxu3 }
 0x1c5   : > { %v1036_v5 = vadd.f32 %v1035_v53, %v987_v9 }
 0x1c7   : > { %1062 = vst [vmem:[%s2129_s12 + $0x48] sm:$0xff] %v1036_v5 }
 0x1ca   : > { %v989_v57 = vpop.f32.mrf.mxu2 }
 0x1cb   : > { %v990_v8 = vadd.f32 %v2124_v31, %v989_v57  ;;  %v1038_v56 = vpop.f32.mrf.mxu3 }
 0x1cd   : > { %v1039_v43 = vadd.f32 %v1038_v56, %v990_v8 }
 0x1cf   : > { %1063 = vst [vmem:[%s2129_s12 + $0x50] sm:$0xff] %v1039_v43 }
 0x1d2   : > { %v991_v61 = vpop.f32.mrf.mxu2 }
 0x1d3   : > { %v992_v10 = vadd.f32 %v2124_v31, %v991_v61  ;;  %v1040_v12 = vpop.f32.mrf.mxu3 }
 0x1d5   : > { %v1041_v13 = vadd.f32 %v1040_v12, %v992_v10 }
 0x1d7   : > { %1064 = vst [vmem:[%s2129_s12 + $0x58] sm:$0xff] %v1041_v13 }
 0x1da   : > { %v994_v52 = vpop.f32.mrf.mxu2 }
 0x1db   : > { %v995_v14 = vadd.f32 %v2124_v31, %v994_v52  ;;  %v1043_v15 = vpop.f32.mrf.mxu3 }
 0x1dd   : > { %v1044_v16 = vadd.f32 %v1043_v15, %v995_v14 }
 0x1df   : > { %1065 = vst [vmem:[%s2129_s12 + $0x60] sm:$0xff] %v1044_v16 }
 0x1e2   : > { %v996_v21 = vpop.f32.mrf.mxu2 }
 0x1e3   : > { %v997_v17 = vadd.f32 %v2124_v31, %v996_v21  ;;  %v1045_v4 = vpop.f32.mrf.mxu3 }
 0x1e5   : > { %v1046_v18 = vadd.f32 %v1045_v4, %v997_v17 }
 0x1e7   : > { %1066 = vst [vmem:[%s2129_s12 + $0x68] sm:$0xff] %v1046_v18 }
 0x1ea   : > { %v999_v7 = vpop.f32.mrf.mxu2 }
 0x1eb   : > { %v1000_v6 = vadd.f32 %v2124_v31, %v999_v7  ;;  %v1048_v20 = vpop.f32.mrf.mxu3 }
 0x1ed   : > { %v1049_v11 = vadd.f32 %v1048_v20, %v1000_v6 }
 0x1ef   : > { %1067 = vst [vmem:[%s2129_s12 + $0x70] sm:$0xff] %v1049_v11 }
 0x1f2   : > { %v1001_v22 = vpop.f32.mrf.mxu2 }
 0x1f3   : > { %v1002_v25 = vadd.f32 %v2124_v31, %v1001_v22  ;;  %v1050_v29 = vpop.f32.mrf.mxu3 }
 0x1f5   : > { %v1051_v59 = vadd.f32 %v1050_v29, %v1002_v25 }
 0x1f7   : > { %1068 = vst [vmem:[%s2129_s12 + $0x78] sm:$0xff] %v1051_v59 }
 0x1f8   : > { %1664 = shalt.err (!%p1661_p10)
}
 0x1f9   : > { %s1720_s26 = smov 128   ;;  %s1721_s29 = smov 8  }
 0x1fa   : > { %1383 = dma.vmem_to_hbm [thread:$0]  (%p1837_p3), %s1083_s15, 2048, %s1085_s7, %s1070_s16, %s1720_s26, %s1720_s26, %s1721_s29  }
 0x1fb PF: > { %s1099_s12 = sand.u32 1, %s1699_s18   ;;  %p2210_p12 = scmp.ge.s32.totalorder %s1711_s21, 2 }
 0x1fc   : > { %s1100_s23 = scalar_lea.sflag [#allocation4], %s1099_s12 }
 0x1fd   : > { %p1400_p13 = pnand %p2210_p12, %p1787_p6 }
 0x1ff   : > { %p1401_p0 = pneg %p1400_p13 }
 0x201   : > { %1694 = dma.done.wait (%p1401_p0), %s1100_s23, 2048  }
 0x202   : > { %1696 = vsyncadd (%p1401_p0), %s1100_s23, 4294965248  ;;  %p20_p5 = scmp.ge.s32.totalorder %s1824_s30, 4   ;;  %s2211_s18 = smov %s1703_s19 }
 0x203   : > { %s2212_s19 = smov %s1707_s20  ;;  %s2213_s20 = smov %s1833_s9 }
 0x204   : > { %s2214_s21 = smov %s1824_s30  ;;  %22 = sbr.rel (!%p20_p5) target bundleno = 7 (0x7), region = 97 }
 0x209   :  { %1106 = vsyncpa [#allocation3], 1 }
 0x20a   :  { %1108 = vsyncpa [#allocation3 + $0x1], 1 }
 0x20b   :  { %1109 = vsyncpa [#allocation6], 1 }
 0x20c   :  { %1110 = vsyncpa [#allocation9], 1 }
 0x20d   :  { %1111 = vsyncpa [#allocation4], 1 }
 0x20e   :  { %1113 = vsyncpa [#allocation4 + $0x1], 1 }

</bundles_post_ra>
